<compile_context>
chip_gen: v7x
topology: tpu7x:2x2x1
jax: 0.10.0
libtpu: 0.0.40
codegen_flags: <defaults>
</compile_context>

<pallas_src>
import functools

import jax
import jax.numpy as jnp
import numpy as np
from jax.experimental import pallas as pl
from jax.experimental.pallas import tpu as pltpu

EPS = 1e-6
_SUBLANE = 8
_LANE = 128


# ----------------------------------------------------------------------------------
# Kernels
# ----------------------------------------------------------------------------------
def _sublayer_connection_kernel(x_ref, w_ref, bias_ref, o_ref):
    """Fused LN-stats -> Linear (MXU) -> residual add; full weight resident in VMEM."""
    x = x_ref[...].astype(jnp.float32)                         # (TM, D) f32
    d = x.shape[-1]

    # One-pass statistics: two independent XLU reductions (sum, sum-of-squares).
    s = jnp.sum(x, axis=-1, keepdims=True)
    ssq = jnp.sum(x * x, axis=-1, keepdims=True)
    mean = s * (1.0 / d)
    var_unbiased = (ssq - d * mean * mean) * (1.0 / (d - 1))   # torch unbiased std
    std = jnp.sqrt(jnp.maximum(var_unbiased, 0.0))
    inv_std = pl.reciprocal(std + EPS, approx=True)            # EUP slot, ~free
    # a_2 / b_2 are folded into w_ref / bias_ref in the wrapper.
    lhs = ((x - mean) * inv_std).astype(jnp.bfloat16)          # (TM, D) bf16

    y = jnp.dot(lhs, w_ref[...], preferred_element_type=jnp.float32) + bias_ref[...]

    # dropout (eval mode -> identity) + residual connection
    # TODO(synk): training-mode dropout (pltpu.prng_*) not implemented; eval semantics.
    o_ref[...] = (x + y).astype(o_ref.dtype)


def _sublayer_connection_kernel_ksplit(x_full_ref, x_kslice_ref, w_ref, bias_ref,
                                       o_ref, acc_ref, mean_ref, inv_ref):
    """K-split variant for large D: weight streamed in (tk, D) tiles, f32 accumulator.

    Grid is (row_tiles, k_tiles) with K last ("arbitrary"); the full-row x block and
    the output block are resident across K (constant block index)."""
    k = pl.program_id(1)

    @pl.when(k == 0)
    def _():
        x = x_full_ref[...].astype(jnp.float32)                # (TM, D)
        d = x.shape[-1]
        s = jnp.sum(x, axis=-1, keepdims=True)
        ssq = jnp.sum(x * x, axis=-1, keepdims=True)
        mean = s * (1.0 / d)
        var_unbiased = (ssq - d * mean * mean) * (1.0 / (d - 1))
        std = jnp.sqrt(jnp.maximum(var_unbiased, 0.0))
        mean_ref[...] = mean
        inv_ref[...] = pl.reciprocal(std + EPS, approx=True)
        acc_ref[...] = jnp.zeros_like(acc_ref)

    lhs = ((x_kslice_ref[...].astype(jnp.float32) - mean_ref[...])
           * inv_ref[...]).astype(jnp.bfloat16)                # (TM, TK) bf16
    acc_ref[...] += jnp.dot(lhs, w_ref[...], preferred_element_type=jnp.float32)

    @pl.when(k == pl.num_programs(1) - 1)
    def _():
        x = x_full_ref[...].astype(jnp.float32)
        # dropout (eval mode -> identity) + residual connection
        o_ref[...] = (x + acc_ref[...] + bias_ref[...]).astype(o_ref.dtype)


# ----------------------------------------------------------------------------------
# Tiling plans
# ----------------------------------------------------------------------------------
def _round_up(n, m):
    return ((n + m - 1) // m) * m


def _vmem_budget_bytes():
    """~70% of this generation's VMEM capacity (falls back to a conservative 64 MiB)."""
    try:
        cap = int(pltpu.get_tpu_info().vmem_capacity_bytes)
    except Exception:
        cap = 64 * 1024 * 1024
    return int(0.70 * cap), cap


def _snap8(t):
    return max(_SUBLANE, (t // _SUBLANE) * _SUBLANE)


def _plan_resident(n_rows, d, x_bytes, out_bytes, requested, budget, w_buffers):
    """Row tile for the resident-weight path, or None if even tm=8 doesn't fit."""
    def need(t):
        return (2 * t * d * x_bytes            # double-buffered x row tile
                + 2 * t * d * out_bytes        # double-buffered output tile
                + w_buffers * d * d * 2        # bf16 weight (1 buffer when Buffered(1))
                + w_buffers * d * 4)           # f32 bias

    if requested is None:
        # Small D -> trivial per-step compute; bigger tiles amortize ~0.35us/step.
        requested = 1024 if d <= 256 else 512
    tm = _snap8(min(requested, _round_up(n_rows, _SUBLANE)))
    while tm > _SUBLANE and need(tm) > budget:
        tm = _snap8(tm // 2)                   # stays a multiple of 8 (review fix)
    if need(tm) > budget:
        return None
    # Megacore balance: keep >= 2 row steps so both v7x TensorCores get work.
    if n_rows > _SUBLANE:
        tm = min(tm, _round_up(pl.cdiv(n_rows, 2), _SUBLANE))
    return tm


def _pick_tk(d):
    """Largest lane-aligned contraction tile dividing D with at least 2 K-steps."""
    for cand in (512, 384, 256, 128):
        if d % cand == 0 and d // cand >= 2:
            return cand
    return None


def _plan_ksplit(n_rows, d, x_bytes, out_bytes, requested, budget):
    tk = _pick_tk(d)

    def need(t):
        return (2 * t * d * x_bytes            # resident full-row x (dbl across rows)
                + 2 * t * tk * x_bytes         # streamed LHS K-slice
                + 2 * tk * d * 2               # streamed bf16 weight K-slice
                + 2 * d * 4                    # bias
                + 2 * t * d * out_bytes        # output tile
                + t * d * 4 + 2 * t * 4)       # f32 accumulator + LN-stat scratch

    if requested is None:
        requested = 512
    tm = _snap8(min(requested, _round_up(n_rows, _SUBLANE)))
    while tm > _SUBLANE and need(tm) > budget:
        tm = _snap8(tm // 2)
    if n_rows > _SUBLANE:
        tm = min(tm, _round_up(pl.cdiv(n_rows, 2), _SUBLANE))
    return tm, tk


# ----------------------------------------------------------------------------------
# Wrapper
# ----------------------------------------------------------------------------------
@functools.partial(jax.jit,
                   static_argnames=("tile_m", "force_k_split", "single_buffer_resident"))
def _sublayer_connection_impl(x, a_2, b_2, w, bw, *, tile_m, force_k_split,
                              single_buffer_resident):
    B, S, D = x.shape
    N = B * S
    x_bytes = jnp.dtype(x.dtype).itemsize     # bf16 activations pass straight through
    out_bytes = x_bytes

    # ---- fold the LayerNorm affine into the linear layer (one-time, f32) ----
    w_f32 = w.astype(jnp.float32)
    w_scaled = (a_2.astype(jnp.float32)[:, None] * w_f32).astype(jnp.bfloat16)
    bias_eff = (b_2.astype(jnp.float32) @ w_f32 + bw.astype(jnp.float32)).reshape(1, D)

    budget, vmem_cap = _vmem_budget_bytes()
    w_buffers = 1 if single_buffer_resident else 2

    tm_res = _plan_resident(N, D, x_bytes, out_bytes, tile_m, budget, w_buffers)
    can_ksplit = _pick_tk(D) is not None
    use_ksplit = force_k_split and can_ksplit
    if not use_ksplit and can_ksplit and (tm_res is None or tm_res < 64):
        # Resident weight would crush the row tile (e.g. v7x 64 MiB/TC at large D).
        use_ksplit = True

    if use_ksplit:
        tm, tk = _plan_ksplit(N, D, x_bytes, out_bytes, tile_m, budget)
    else:
        tm, tk = (tm_res if tm_res is not None else _SUBLANE), None

    N_pad = _round_up(N, tm)
    x2 = x.reshape(N, D)
    if N_pad != N:
        x2 = jnp.pad(x2, ((0, N_pad - N), (0, 0)))

    if not use_ksplit:
        vmem_needed = (2 * tm * D * x_bytes + 2 * tm * D * out_bytes
                       + w_buffers * D * D * 2 + w_buffers * D * 4)
        vmem_limit = int(min(max(2 * vmem_needed, 32 * 1024 * 1024), vmem_cap))
        cost = pl.CostEstimate(
            flops=2 * N_pad * D * D + 8 * N_pad * D,
            transcendentals=2 * N_pad,                         # sqrt + reciprocal / row
            bytes_accessed=(N_pad * D * (x_bytes + out_bytes)  # x read + out write
                            + D * D * 2 + D * 4),
        )
        w_kwargs = ({"pipeline_mode": pl.Buffered(1)} if single_buffer_resident else {})
        out = pl.pallas_call(
            _sublayer_connection_kernel,
            out_shape=jax.ShapeDtypeStruct((N_pad, D), x.dtype),
            grid_spec=pltpu.PrefetchScalarGridSpec(
                num_scalar_prefetch=0,
                grid=(N_pad // tm,),
                in_specs=[
                    pl.BlockSpec((tm, D), lambda i: (i, 0)),             # x row tile
                    pl.BlockSpec((D, D), lambda i: (0, 0), **w_kwargs),  # folded weight
                    pl.BlockSpec((1, D), lambda i: (0, 0), **w_kwargs),  # folded bias
                ],
                out_specs=pl.BlockSpec((tm, D), lambda i: (i, 0)),
            ),
            compiler_params=pltpu.CompilerParams(
                dimension_semantics=("parallel",),     # shards across 2 TCs on v7x
                vmem_limit_bytes=vmem_limit,
            ),
            cost_estimate=cost,
        )(x2, w_scaled, bias_eff)
    else:
        nk = D // tk
        vmem_needed = (2 * tm * D * x_bytes + 2 * tm * tk * x_bytes
                       + 2 * tk * D * 2 + 2 * D * 4
                       + 2 * tm * D * out_bytes + tm * D * 4 + 2 * tm * 4)
        vmem_limit = int(min(max(2 * vmem_needed, 32 * 1024 * 1024), vmem_cap))
        cost = pl.CostEstimate(
            flops=2 * N_pad * D * D + 8 * N_pad * D,
            transcendentals=2 * N_pad,
            bytes_accessed=(2 * N_pad * D * x_bytes + N_pad * D * out_bytes
                            + (N_pad // tm) * D * D * 2 + D * 4),
        )
        out = pl.pallas_call(
            _sublayer_connection_kernel_ksplit,
            out_shape=jax.ShapeDtypeStruct((N_pad, D), x.dtype),
            grid_spec=pltpu.PrefetchScalarGridSpec(
                num_scalar_prefetch=0,
                grid=(N_pad // tm, nk),
                in_specs=[
                    pl.BlockSpec((tm, D), lambda i, k: (i, 0)),    # full row: stats+resid
                    pl.BlockSpec((tm, tk), lambda i, k: (i, k)),   # LHS K-slice
                    pl.BlockSpec((tk, D), lambda i, k: (k, 0)),    # streamed weight slice
                    pl.BlockSpec((1, D), lambda i, k: (0, 0)),     # folded bias
                ],
                out_specs=pl.BlockSpec((tm, D), lambda i, k: (i, 0)),
                scratch_shapes=[
                    pltpu.VMEM((tm, D), jnp.float32),   # f32 accumulator
                    pltpu.VMEM((tm, 1), jnp.float32),   # mean
                    pltpu.VMEM((tm, 1), jnp.float32),   # 1 / (std + eps)
                ],
            ),
            compiler_params=pltpu.CompilerParams(
                dimension_semantics=("parallel", "arbitrary"),
                vmem_limit_bytes=vmem_limit,
            ),
            cost_estimate=cost,
        )(x2, x2, w_scaled, bias_eff)

    return out[:N].reshape(B, S, D)


def sublayer_connection(x, a_2, b_2, w, bw, *, tile_m=None, force_k_split=False):
    """out = x + Linear(LayerNorm(x)); dropout is eval-mode (identity).

    Tries the single-buffered resident-weight variant first; falls back to default
    double-buffering if this jax build rejects pipeline_mode=pl.Buffered(1)."""
    try:
        return _sublayer_connection_impl(x, a_2, b_2, w, bw, tile_m=tile_m,
                                         force_k_split=force_k_split,
                                         single_buffer_resident=True)
    except Exception:
        return _sublayer_connection_impl(x, a_2, b_2, w, bw, tile_m=tile_m,
                                         force_k_split=force_k_split,
                                         single_buffer_resident=False)


# ----------------------------------------------------------------------------------
# Reference + demo
# ----------------------------------------------------------------------------------
def _reference(x, a_2, b_2, w, bw):
    x = x.astype(jnp.float32)
    d = x.shape[-1]
    mean = jnp.mean(x, axis=-1, keepdims=True)
    centered = x - mean
    std = jnp.sqrt(jnp.sum(centered * centered, axis=-1, keepdims=True) / (d - 1))
    normed = a_2 * centered / (std + EPS) + b_2
    y = jnp.einsum("bsd,de->bse", normed, w) + bw
    return x + y


if __name__ == "__main__":
    key = jax.random.PRNGKey(0)
    kx, kw, kb, ka, kbb = jax.random.split(key, 5)

    # --- Case 1: resident-weight path (small lane-dense d_model) ---
    B, S, D = 2, 8, 128
    x = jax.random.normal(kx, (B, S, D), dtype=jnp.float32)
    a_2 = 1.0 + 0.1 * jax.random.normal(ka, (D,), dtype=jnp.float32)
    b_2 = 0.1 * jax.random.normal(kbb, (D,), dtype=jnp.float32)
    w = 0.05 * jax.random.normal(kw, (D, D), dtype=jnp.float32)
    bw = 0.01 * jax.random.normal(kb, (D,), dtype=jnp.float32)

    out = jax.block_until_ready(sublayer_connection(x, a_2, b_2, w, bw))
    ref = _reference(x, a_2, b_2, w, bw)
    # bf16 MXU operands (f32 accumulate) + approx reciprocal loosen the tolerance.
    np.testing.assert_allclose(np.asarray(out), np.asarray(ref), rtol=2e-2, atol=2e-2)

    # --- Case 2: exercise the K-split (streamed-weight) path used for large D on v7x ---
    D2 = 256
    x2 = jax.random.normal(kx, (B, S, D2), dtype=jnp.float32)
    a2 = 1.0 + 0.1 * jax.random.normal(ka, (D2,), dtype=jnp.float32)
    b2 = 0.1 * jax.random.normal(kbb, (D2,), dtype=jnp.float32)
    w2 = 0.05 * jax.random.normal(kw, (D2, D2), dtype=jnp.float32)
    bw2 = 0.01 * jax.random.normal(kb, (D2,), dtype=jnp.float32)

    out2 = jax.block_until_ready(
        sublayer_connection(x2, a2, b2, w2, bw2, force_k_split=True))
    ref2 = _reference(x2, a2, b2, w2, bw2)
    np.testing.assert_allclose(np.asarray(out2), np.asarray(ref2), rtol=2e-2, atol=2e-2)

    print("KERNEL_OK")
</pallas_src>

<mosaic_0001>
module attributes {stable_mosaic.version = 11 : i64} {
  func.func @_sublayer_connection_kernel(%arg0: i32, %arg1: memref<8x128xf32, #tpu.memory_space<vmem>>, %arg2: memref<128x128xbf16, #tpu.memory_space<vmem>>, %arg3: memref<1x128xf32, #tpu.memory_space<vmem>>, %arg4: memref<8x128xf32, #tpu.memory_space<vmem>>) attributes {dimension_semantics = [#tpu.dimension_semantics<parallel>], iteration_bounds = array<i64: 2>, scalar_prefetch = 0 : i64, scratch_operands = 0 : i64, tpu.core_type = #tpu.core_type<tc>, window_params = [{transform_indices = @transform_0, window_bounds = array<i64: 8, 128>}, {pipeline_mode = #tpu.pipeline_mode<synchronous>, transform_indices = @transform_1, window_bounds = array<i64: 128, 128>}, {pipeline_mode = #tpu.pipeline_mode<synchronous>, transform_indices = @transform_2, window_bounds = array<i64: 1, 128>}, {transform_indices = @transform_3, window_bounds = array<i64: 8, 128>}]} {
    %c0 = arith.constant 0 : index
    %c0_0 = arith.constant 0 : index
    %0 = vector.load %arg1[%c0, %c0_0] : memref<8x128xf32, #tpu.memory_space<vmem>>, vector<8x128xf32>
    %cst = arith.constant dense<0.000000e+00> : vector<8xf32>
    %1 = vector.multi_reduction <add>, %0, %cst [1] : vector<8x128xf32> to vector<8xf32>
    %2 = vector.shape_cast %1 : vector<8xf32> to vector<8x1xf32>
    %3 = arith.mulf %0, %0 : vector<8x128xf32>
    %cst_1 = arith.constant dense<0.000000e+00> : vector<8xf32>
    %4 = vector.multi_reduction <add>, %3, %cst_1 [1] : vector<8x128xf32> to vector<8xf32>
    %5 = vector.shape_cast %4 : vector<8xf32> to vector<8x1xf32>
    %cst_2 = arith.constant 7.812500e-03 : f32
    %6 = vector.broadcast %cst_2 : f32 to vector<8x1xf32>
    %7 = arith.mulf %2, %6 : vector<8x1xf32>
    %cst_3 = arith.constant 1.280000e+02 : f32
    %8 = vector.broadcast %cst_3 : f32 to vector<8x1xf32>
    %9 = arith.mulf %8, %7 : vector<8x1xf32>
    %10 = arith.mulf %9, %7 : vector<8x1xf32>
    %11 = arith.subf %5, %10 : vector<8x1xf32>
    %cst_4 = arith.constant 0.00787401571 : f32
    %12 = vector.broadcast %cst_4 : f32 to vector<8x1xf32>
    %13 = arith.mulf %11, %12 : vector<8x1xf32>
    %cst_5 = arith.constant 0.000000e+00 : f32
    %14 = vector.broadcast %cst_5 : f32 to vector<8x1xf32>
    %15 = arith.maximumf %13, %14 : vector<8x1xf32>
    %16 = math.sqrt %15 : vector<8x1xf32>
    %cst_6 = arith.constant 9.99999997E-7 : f32
    %17 = vector.broadcast %cst_6 : f32 to vector<8x1xf32>
    %18 = arith.addf %16, %17 : vector<8x1xf32>
    %19 = tpu.reciprocal %18 {approx = true} : vector<8x1xf32> -> vector<8x1xf32>
    %20 = vector.broadcast %7 : vector<8x1xf32> to vector<8x128xf32>
    %21 = arith.subf %0, %20 : vector<8x128xf32>
    %22 = vector.broadcast %19 : vector<8x1xf32> to vector<8x128xf32>
    %23 = arith.mulf %21, %22 : vector<8x128xf32>
    %24 = arith.truncf %23 : vector<8x128xf32> to vector<8x128xbf16>
    %c0_7 = arith.constant 0 : index
    %c0_8 = arith.constant 0 : index
    %25 = vector.load %arg2[%c0_7, %c0_8] : memref<128x128xbf16, #tpu.memory_space<vmem>>, vector<128x128xbf16>
    %cst_9 = arith.constant dense<0.000000e+00> : vector<8x128xf32>
    %26 = tpu.matmul %24, %25, %cst_9 {dimension_numbers = #tpu.dot_dimension_numbers<[1], [0], [0], [1], [0, 0, 1, 1], [], []>} : vector<8x128xbf16>, vector<128x128xbf16>, vector<8x128xf32> -> vector<8x128xf32>
    %c0_10 = arith.constant 0 : index
    %c0_11 = arith.constant 0 : index
    %27 = vector.load %arg3[%c0_10, %c0_11] : memref<1x128xf32, #tpu.memory_space<vmem>>, vector<1x128xf32>
    %28 = vector.broadcast %27 : vector<1x128xf32> to vector<8x128xf32>
    %29 = arith.addf %26, %28 : vector<8x128xf32>
    %30 = arith.addf %0, %29 : vector<8x128xf32>
    %c0_12 = arith.constant 0 : index
    %c0_13 = arith.constant 0 : index
    %31 = vector.load %arg4[%c0_12, %c0_13] : memref<8x128xf32, #tpu.memory_space<vmem>>, vector<8x128xf32>
    tpu.vector_store %arg4[%c0_12, %c0_13], %30 {strides = array<i32>} : memref<8x128xf32, #tpu.memory_space<vmem>>, vector<8x128xf32>,
    return
  }
  func.func @transform_0(%arg0: i32) -> (i32, i32) {
    %c0_i32 = arith.constant 0 : i32
    %c0_i32_0 = arith.constant 0 : i32
    return %arg0, %c0_i32 : i32, i32
  }
  func.func @transform_1(%arg0: i32) -> (i32, i32) {
    %c0_i32 = arith.constant 0 : i32
    %c0_i32_0 = arith.constant 0 : i32
    %c0_i32_1 = arith.constant 0 : i32
    return %c0_i32, %c0_i32_0 : i32, i32
  }
  func.func @transform_2(%arg0: i32) -> (i32, i32) {
    %c0_i32 = arith.constant 0 : i32
    %c0_i32_0 = arith.constant 0 : i32
    %c0_i32_1 = arith.constant 0 : i32
    return %c0_i32, %c0_i32_0 : i32, i32
  }
  func.func @transform_3(%arg0: i32) -> (i32, i32) {
    %c0_i32 = arith.constant 0 : i32
    %c0_i32_0 = arith.constant 0 : i32
    return %arg0, %c0_i32 : i32, i32
  }
}

module attributes {stable_mosaic.version = 11 : i64} {
  func.func @_sublayer_connection_kernel(%arg0: i32, %arg1: memref<8x128xf32, #tpu.memory_space<vmem>>, %arg2: memref<128x128xbf16, #tpu.memory_space<vmem>>, %arg3: memref<1x128xf32, #tpu.memory_space<vmem>>, %arg4: memref<8x128xf32, #tpu.memory_space<vmem>>) attributes {dimension_semantics = [#tpu.dimension_semantics<parallel>], iteration_bounds = array<i64: 2>, scalar_prefetch = 0 : i64, scratch_operands = 0 : i64, tpu.core_type = #tpu.core_type<tc>, window_params = [{transform_indices = @transform_0, window_bounds = array<i64: 8, 128>}, {pipeline_mode = #tpu.pipeline_mode<synchronous>, transform_indices = @transform_1, window_bounds = array<i64: 128, 128>}, {pipeline_mode = #tpu.pipeline_mode<synchronous>, transform_indices = @transform_2, window_bounds = array<i64: 1, 128>}, {transform_indices = @transform_3, window_bounds = array<i64: 8, 128>}]} {
    %c0 = arith.constant 0 : index
    %c0_0 = arith.constant 0 : index
    %0 = vector.load %arg1[%c0, %c0_0] : memref<8x128xf32, #tpu.memory_space<vmem>>, vector<8x128xf32>
    %cst = arith.constant dense<0.000000e+00> : vector<8xf32>
    %1 = vector.multi_reduction <add>, %0, %cst [1] : vector<8x128xf32> to vector<8xf32>
    %2 = vector.shape_cast %1 : vector<8xf32> to vector<8x1xf32>
    %3 = arith.mulf %0, %0 : vector<8x128xf32>
    %cst_1 = arith.constant dense<0.000000e+00> : vector<8xf32>
    %4 = vector.multi_reduction <add>, %3, %cst_1 [1] : vector<8x128xf32> to vector<8xf32>
    %5 = vector.shape_cast %4 : vector<8xf32> to vector<8x1xf32>
    %cst_2 = arith.constant 7.812500e-03 : f32
    %6 = vector.broadcast %cst_2 : f32 to vector<8x1xf32>
    %7 = arith.mulf %2, %6 : vector<8x1xf32>
    %cst_3 = arith.constant 1.280000e+02 : f32
    %8 = vector.broadcast %cst_3 : f32 to vector<8x1xf32>
    %9 = arith.mulf %8, %7 : vector<8x1xf32>
    %10 = arith.mulf %9, %7 : vector<8x1xf32>
    %11 = arith.subf %5, %10 : vector<8x1xf32>
    %cst_4 = arith.constant 0.00787401571 : f32
    %12 = vector.broadcast %cst_4 : f32 to vector<8x1xf32>
    %13 = arith.mulf %11, %12 : vector<8x1xf32>
    %cst_5 = arith.constant 0.000000e+00 : f32
    %14 = vector.broadcast %cst_5 : f32 to vector<8x1xf32>
    %15 = arith.maximumf %13, %14 : vector<8x1xf32>
    %16 = math.sqrt %15 : vector<8x1xf32>
    %cst_6 = arith.constant 9.99999997E-7 : f32
    %17 = vector.broadcast %cst_6 : f32 to vector<8x1xf32>
    %18 = arith.addf %16, %17 : vector<8x1xf32>
    %19 = tpu.reciprocal %18 {approx = true} : vector<8x1xf32> -> vector<8x1xf32>
    %20 = vector.broadcast %7 : vector<8x1xf32> to vector<8x128xf32>
    %21 = arith.subf %0, %20 : vector<8x128xf32>
    %22 = vector.broadcast %19 : vector<8x1xf32> to vector<8x128xf32>
    %23 = arith.mulf %21, %22 : vector<8x128xf32>
    %24 = arith.truncf %23 : vector<8x128xf32> to vector<8x128xbf16>
    %c0_7 = arith.constant 0 : index
    %c0_8 = arith.constant 0 : index
    %25 = vector.load %arg2[%c0_7, %c0_8] : memref<128x128xbf16, #tpu.memory_space<vmem>>, vector<128x128xbf16>
    %cst_9 = arith.constant dense<0.000000e+00> : vector<8x128xf32>
    %26 = tpu.matmul %24, %25, %cst_9 {dimension_numbers = #tpu.dot_dimension_numbers<[1], [0], [0], [1], [0, 0, 1, 1], [], []>} : vector<8x128xbf16>, vector<128x128xbf16>, vector<8x128xf32> -> vector<8x128xf32>
    %c0_10 = arith.constant 0 : index
    %c0_11 = arith.constant 0 : index
    %27 = vector.load %arg3[%c0_10, %c0_11] : memref<1x128xf32, #tpu.memory_space<vmem>>, vector<1x128xf32>
    %28 = vector.broadcast %27 : vector<1x128xf32> to vector<8x128xf32>
    %29 = arith.addf %26, %28 : vector<8x128xf32>
    %30 = arith.addf %0, %29 : vector<8x128xf32>
    %c0_12 = arith.constant 0 : index
    %c0_13 = arith.constant 0 : index
    %31 = vector.load %arg4[%c0_12, %c0_13] : memref<8x128xf32, #tpu.memory_space<vmem>>, vector<8x128xf32>
    tpu.vector_store %arg4[%c0_12, %c0_13], %30 {strides = array<i32>} : memref<8x128xf32, #tpu.memory_space<vmem>>, vector<8x128xf32>,
    return
  }
  func.func @transform_0(%arg0: i32) -> (i32, i32) {
    %c0_i32 = arith.constant 0 : i32
    %c0_i32_0 = arith.constant 0 : i32
    return %arg0, %c0_i32 : i32, i32
  }
  func.func @transform_1(%arg0: i32) -> (i32, i32) {
    %c0_i32 = arith.constant 0 : i32
    %c0_i32_0 = arith.constant 0 : i32
    %c0_i32_1 = arith.constant 0 : i32
    return %c0_i32, %c0_i32_0 : i32, i32
  }
  func.func @transform_2(%arg0: i32) -> (i32, i32) {
    %c0_i32 = arith.constant 0 : i32
    %c0_i32_0 = arith.constant 0 : i32
    %c0_i32_1 = arith.constant 0 : i32
    return %c0_i32, %c0_i32_0 : i32, i32
  }
  func.func @transform_3(%arg0: i32) -> (i32, i32) {
    %c0_i32 = arith.constant 0 : i32
    %c0_i32_0 = arith.constant 0 : i32
    return %arg0, %c0_i32 : i32, i32
  }
}

</mosaic_0001>

<bundles_post_ra>
// kernel: _sublayer_connection_impl.1
= control target key start
LH: loop header
LB: loop body
LE: loop exit
PB: predicated region body
PF: predicated region fallthrough
CT: control target
= control target key end

     0   :  { %8 = vsyncpa [#allocation3], 0  ;;  %s699_s0 = inlined_call_operand.vmem [shape: f32[16,128], index: 0, kind: input, shape index: {}]   ;;  %s700_s1 = inlined_call_operand.vmem [shape: bf16[128,128], index: 1, kind: input, shape index: {}]   ;;  %s701_s2 = inlined_call_operand.vmem [shape: f32[1,128], index: 2, kind: input, shape index: {}]   ;;  %s702_s3 = inlined_call_operand.hbm [shape: f32[16,128], index: 3, kind: output, shape index: {}]  }
   0x1   :  { %10 = vsyncpa [#allocation3 + $0x1], 0  ;;  %s565_s12 = smov 0   ;;  %s567_s13 = smov 0  }
   0x2   :  { %s569_s14 = smov 0   ;;  %s571_s15 = smov 0  }
   0x3 LB: > { %s586_s16 = sadd.s32 4294967295, %s540_s15   ;;  %s377_s17 = sadd.s32 4294967294, %s540_s15   ;;  %s540_s15 = sphi %s571_s15, %s708_s15   ;;  %s536_s14 = sphi %s569_s14, %s707_s14   ;;  %s532_s13 = sphi %s567_s13, %s706_s13   ;;  %s528_s12 = sphi %s565_s12, %s705_s12  }
   0x4   : > { %s590_s18 = sadd.s32 1, %s540_s15   ;;  %s91_s19 = sadd.s32 1, %s536_s14 }
   0x5   : > { %s88_s20 = ssub.s32 %s540_s15, %s590_s18  ;;  %p101_p0 = scmp.ne.s32.totalorder %s536_s14, %s532_s13 }
   0x6   : > { %p89_p1 = scmp.eq.s32.totalorder %s88_s20, 0  ;;  %p102_p2 = scmp.eq.s32.totalorder %s586_s16, 1 }
   0x7   : > { %p107_p3 = scmp.ne.s32.totalorder %s532_s13, %s528_s12  ;;  %p108_p4 = scmp.eq.s32.totalorder %s377_s17, 1 }
   0x8   : > { %s601_s21 = scalar_select %p89_p1, %s536_s14, %s91_s19  }
   0x9   : > { %p603_p5 = por %p102_p2, %p101_p0  ;;  %p607_p6 = por %p108_p4, %p107_p3 }
   0xa   : > { %p380_p7 = scmp.ge.s32.totalorder %s540_s15, 1  ;;  %p139_p8 = scmp.lt.s32.totalorder %s540_s15, 3 }
   0xc   : > { %p140_p9 = pnand %p380_p7, %p139_p8 }
   0xd   : > { %p162_p10 = scmp.lt.s32.totalorder (!%p140_p9), %s586_s16, 1  ;;  %v466_v2 = vld [vmem:[%s700_s1] sm:$0xff] (!%p140_p9)   ;;  %v542_v3 = vmov (!%p140_p9), 0.0   ;;  %v467_v4 = vld [vmem:[%s700_s1 + $0x8] sm:$0xff] (!%p140_p9)   ;;  %v468_v5 = vld [vmem:[%s700_s1 + $0x10] sm:$0xff] (!%p140_p9)   ;;  %vm543_vm0 = vmmov (!%p140_p9), 0  }
   0xe   : > { %143 = sbr.rel (%p140_p9) target bundleno = 442 (0x1ba), region = 32  ;;  %405 = vmatprep.subr.bf16.mxu0 (!%p140_p9), %v542_v3  ;;  %v469_v6 = vld [vmem:[%s700_s1 + $0x18] sm:$0xff] (!%p140_p9)   ;;  %421 = vmatprep.mubr.msk.bf16.mxu0 (!%p140_p9), %vm543_vm0, %v542_v3  ;;  %v470_v7 = vld [vmem:[%s700_s1 + $0x20] sm:$0xff] (!%p140_p9)   ;;  %v471_v8 = vld [vmem:[%s700_s1 + $0x28] sm:$0xff] (!%p140_p9)   ;;  %s159_s27 = sand.u32 (!%p140_p9), 1, %s532_s13  }
   0xf   : > { %406 = vmatpush3.bf16.msra.mxu0 (!%p140_p9), %v466_v2  ;;  %v472_v9 = vld [vmem:[%s700_s1 + $0x30] sm:$0xff] (!%p140_p9)   ;;  %v473_v10 = vld [vmem:[%s700_s1 + $0x38] sm:$0xff] (!%p140_p9)   ;;  %v383_v29 = vld [vmem:[%s701_s2] ss:$0 sm:$0xff] (!%p140_p9)  ;;  %s393_s4 = sshll.u32 (!%p140_p9), %s586_s16, 7  ;;  %s544_s11 = smov (!%p140_p9), [#allocation2]  }
  0x10   : > { %407 = vmatprep.subr.bf16.mxu0 (!%p140_p9), %v542_v3  ;;  %s657_s9 = scalar_lea.hbm (!%p140_p9), %s702_s3, %s393_s4  ;;  %s482_s17 = sshll.u32 (!%p140_p9), %s544_s11, 4  ;;  %s483_s17 = int_to_ptr.vmem [resolvable:$false] %s482_s17 }
  0x11   : > { %s484_s19 = scalar_lea.vmem (!%p140_p9), %s483_s17, 256 }
  0x13   : > { %408 = vmatpush3.bf16.msra.mxu0 (!%p140_p9), %v467_v4 }
  0x14   : > { %409 = vmatprep.subr.bf16.mxu0 (!%p140_p9), %v542_v3 }
  0x15   : > { %s163_s24 = scalar_select %p162_p10, %s586_s16, 1 }
  0x16   : > { %s305_s16 = scalar_lea.sflag [#allocation3], %s159_s27 }
  0x17   : > { %s382_s25 = sshll.u32 %s163_s24, 3  ;;  %410 = vmatpush3.bf16.msra.mxu0 %v468_v5 }
  0x18   : > { %s165_s28 = scalar_lea.vmem %s699_s0, %s382_s25  ;;  %411 = vmatprep.subr.bf16.mxu0 %v542_v3 }
  0x19   : > { %v618_v0 = vld [vmem:[%s165_s28] sm:$0xff]  ;;  %s381_s28 = sshll.u32 %s159_s27, 3 }
  0x1a   : > { %168 = vadd.xlane.f32.xlu0 %v618_v0  ;;  %v170_v1 = vmul.f32 %v618_v0, %v618_v0  ;;  %s161_s5 = scalar_lea.vmem [#allocation2], %s381_s28 }
  0x1b   : > { %412 = vmatpush3.bf16.msra.mxu0 %v469_v6  ;;  %s318_s6 = sshll.u32 %s161_s5, 4  ;;  %s659_s6 = int_to_ptr.vmem [resolvable:$true] %s318_s6 }
  0x1c   : > { %413 = vmatprep.subr.bf16.mxu0 %v542_v3  ;;  %s478_s10 = scalar_lea.vmem %s659_s6, 128  ;;  %p485_p0 = scmp.lt.s32.totalorder %s659_s6, %s483_s17 }
  0x1d   : > { %p479_p11 = scmp.ne.s32.totalorder %s659_s6, %s478_s10  ;;  %p486_p1 = scmp.lt.s32.totalorder %s484_s19, %s478_s10 }
  0x1e   : > { %171 = vadd.xlane.f32.xlu0 %v170_v1 }
  0x1f   : > { %414 = vmatpush3.bf16.msra.mxu0 %v470_v7  ;;  %p480_p12 = pnand %p479_p11, %p603_p5  ;;  %p487_p2 = por %p486_p1, %p485_p0 }
  0x20   : > { %415 = vmatprep.subr.bf16.mxu0 %v542_v3 }
  0x21   : > { %p481_p13 = pneg %p480_p12 }
  0x23   : > { %416 = vmatpush3.bf16.msra.mxu0 %v471_v8  ;;  %p488_p3 = pnand %p487_p2, %p481_p13 }
  0x24   : > { %417 = vmatprep.subr.bf16.mxu0 %v542_v3 }
  0x27   : > { %418 = vmatpush3.bf16.msra.mxu0 %v472_v9 }
  0x28   : > { %419 = vmatprep.subr.bf16.mxu0 %v542_v3 }
  0x2b   : > { %420 = vmatpush3.bf16.msra.mxu0 %v473_v10 }
  0xa7   : > { %v169_v11 = vpop.xlane.xlu0 %168 }
  0xa8   : > { %v173_v12 = vmul.f32 0.0078125, %v169_v11 }
  0xaa   : > { %v174_v13 = vmul.f32 128.0, %v173_v12  ;;  %v188_v25 = vsub.f32 %v618_v0, %v173_v12 }
  0xab   : > { %v172_v14 = vpop.xlane.xlu0 %171 }
  0xac   : > { %v175_v15 = vmul.f32 %v174_v13, %v173_v12 }
  0xae   : > { %v176_v16 = vsub.f32 %v172_v14, %v175_v15 }
  0xb0   : > { %v177_v17 = vmul.f32 0.007874016, %v176_v16 }
  0xb2   : > { %v178_v18 = vmax.f32 %v177_v17, 0.0 }
  0xb4   : > { %474 = vrsqrt.f32 %v178_v18  ;;  %vm181_vm1 = vcmp.eq.f32.partialorder %v178_v18, inf  ;;  %v184_v21 = vand.u32 2147483648, %v178_v18  ;;  %vm183_vm2 = vcmp.eq.f32.partialorder %v178_v18, 0.0 }
  0xbe   : > { %v475_v19 = vpop.eup %474 }
  0xbf   : > { %v180_v20 = vmul.f32 %v475_v19, %v178_v18 }
  0xc1   : > { %v182_v22 = vsel %vm181_vm1, %v178_v18, %v180_v20 }
  0xc2   : > { %v185_v23 = vsel %vm183_vm2, %v184_v21, %v182_v22 }
  0xc3   : > { %v186_v24 = vadd.f32 1e-06, %v185_v23 }
  0xc5   : > { %476 = vrcp.f32 %v186_v24 }
  0xcf   : > { %v477_v26 = vpop.eup %476 }
  0xd0   : > { %v189_v27 = vmul.f32 %v477_v26, %v188_v25 }
  0xd2   : > { %v190_v28 = vpack.c.bf16 %v189_v27, %v189_v27 }
  0xd4   : > { %422 = vmatmul.mubr.bf16.vlgmr.msra.gmra.mrb[0].mxu0 %v190_v28 }
 0x1a7   : > { %v296_v30 = vpop.f32.mrb[0].mxu0 }
 0x1a8   : > { %v297_v31 = vadd.f32 %v383_v29, %v296_v30  ;;  %v423_v32 = vpop.f32.mrb[1].mxu0 }
 0x1a9   : > { %v299_v33 = vpop.f32.mrb[2].mxu0 }
 0x1aa   : > { %v302_v34 = vadd.f32 %v297_v31, %v618_v0  ;;  %v424_v35 = vpop.f32.mrb[3].mxu0 }
 0x1ac   : > { %303 = vst [vmem:[%s161_s5] sm:$0xff] %v302_v34 }
 0x1ad   : > { %491 = shalt.err (!%p488_p3)
}
 0x1ae   : > { %s492_s20 = scalar_lea.hbm %s657_s9, 128  ;;  %s496_s26 = scalar_lea.hbm %s702_s3, 256 }
 0x1af   : > { %p493_p4 = scmp.ne.s32.totalorder %s657_s9, %s492_s20  ;;  %p497_p9 = scmp.lt.u32.totalorder %s657_s9, %s702_s3 }
 0x1b0   : > { %p498_p10 = scmp.lt.u32.totalorder %s496_s26, %s492_s20  ;;  %p500_p12 = scmp.lt.u32.totalorder %s492_s20, %s657_s9 }
 0x1b1   : > { %p494_p7 = pnand %p493_p4, %p603_p5 }
 0x1b2   : > { %p499_p11 = por %p498_p10, %p497_p9 }
 0x1b3   : > { %p495_p8 = pneg %p494_p7 }
 0x1b4   : > { %p501_p13 = por %p500_p12, %p499_p11 }
 0x1b6   : > { %p502_p0 = pnand %p501_p13, %p495_p8 }
 0x1b8   : > { %505 = shalt.err (!%p502_p0)
}
 0x1b9   : > { %425 = dma.vmem_to_hbm [thread:$0]  (%p603_p5), %s659_s6, 128, %s657_s9, %s305_s16  }
 0x1ba PF: > { %p431_p1 = scmp.ge.s32.totalorder %s540_s15, 2  ;;  %s330_s29 = sand.u32 1, %s528_s12  }
 0x1bb   : > { %s331_s30 = scalar_lea.sflag [#allocation3], %s330_s29 }
 0x1bc   : > { %p428_p2 = pnand %p431_p1, %p607_p6 }
 0x1be   : > { %523 = dma.done.wait (!%p428_p2), %s331_s30, 128  }
 0x1bf   : > { %525 = vsyncadd (!%p428_p2), %s331_s30, 4294967168  ;;  %p13_p3 = scmp.ge.s32.totalorder %s590_s18, 4   ;;  %s705_s12 = smov %s532_s13 }
 0x1c0   : > { %s706_s13 = smov %s536_s14  ;;  %s707_s14 = smov %s601_s21 }
 0x1c1   : > { %s708_s15 = smov %s590_s18  ;;  %15 = sbr.rel (!%p13_p3) target bundleno = 3 (0x3), region = 67 }
 0x1c8   :  { %336 = vsyncpa [#allocation3], 1 }
 0x1c9   :  { %338 = vsyncpa [#allocation3 + $0x1], 1 }

// kernel: _sublayer_connection_impl.1
= control target key start
LH: loop header
LB: loop body
LE: loop exit
PB: predicated region body
PF: predicated region fallthrough
CT: control target
= control target key end

     0   :  { %8 = vsyncpa [#allocation3], 0  ;;  %s699_s0 = inlined_call_operand.vmem [shape: f32[16,128], index: 0, kind: input, shape index: {}]   ;;  %s700_s1 = inlined_call_operand.vmem [shape: bf16[128,128], index: 1, kind: input, shape index: {}]   ;;  %s701_s2 = inlined_call_operand.vmem [shape: f32[1,128], index: 2, kind: input, shape index: {}]   ;;  %s702_s3 = inlined_call_operand.hbm [shape: f32[16,128], index: 3, kind: output, shape index: {}]  }
   0x1   :  { %10 = vsyncpa [#allocation3 + $0x1], 0  ;;  %s565_s12 = smov 0   ;;  %s567_s13 = smov 0  }
   0x2   :  { %s569_s14 = smov 0   ;;  %s571_s15 = smov 0  }
   0x3 LB: > { %s586_s16 = sadd.s32 4294967295, %s540_s15   ;;  %s377_s17 = sadd.s32 4294967294, %s540_s15   ;;  %s540_s15 = sphi %s571_s15, %s708_s15   ;;  %s536_s14 = sphi %s569_s14, %s707_s14   ;;  %s532_s13 = sphi %s567_s13, %s706_s13   ;;  %s528_s12 = sphi %s565_s12, %s705_s12  }
   0x4   : > { %s590_s18 = sadd.s32 1, %s540_s15   ;;  %s91_s19 = sadd.s32 1, %s536_s14 }
   0x5   : > { %s88_s20 = ssub.s32 %s540_s15, %s590_s18  ;;  %p101_p0 = scmp.ne.s32.totalorder %s536_s14, %s532_s13 }
   0x6   : > { %p89_p1 = scmp.eq.s32.totalorder %s88_s20, 0  ;;  %p102_p2 = scmp.eq.s32.totalorder %s586_s16, 1 }
   0x7   : > { %p107_p3 = scmp.ne.s32.totalorder %s532_s13, %s528_s12  ;;  %p108_p4 = scmp.eq.s32.totalorder %s377_s17, 1 }
   0x8   : > { %s601_s21 = scalar_select %p89_p1, %s536_s14, %s91_s19  }
   0x9   : > { %p603_p5 = por %p102_p2, %p101_p0  ;;  %p607_p6 = por %p108_p4, %p107_p3 }
   0xa   : > { %p380_p7 = scmp.ge.s32.totalorder %s540_s15, 1  ;;  %p139_p8 = scmp.lt.s32.totalorder %s540_s15, 3 }
   0xc   : > { %p140_p9 = pnand %p380_p7, %p139_p8 }
   0xd   : > { %p162_p10 = scmp.lt.s32.totalorder (!%p140_p9), %s586_s16, 1  ;;  %v466_v2 = vld [vmem:[%s700_s1] sm:$0xff] (!%p140_p9)   ;;  %v542_v3 = vmov (!%p140_p9), 0.0   ;;  %v467_v4 = vld [vmem:[%s700_s1 + $0x8] sm:$0xff] (!%p140_p9)   ;;  %v468_v5 = vld [vmem:[%s700_s1 + $0x10] sm:$0xff] (!%p140_p9)   ;;  %vm543_vm0 = vmmov (!%p140_p9), 0  }
   0xe   : > { %143 = sbr.rel (%p140_p9) target bundleno = 442 (0x1ba), region = 32  ;;  %405 = vmatprep.subr.bf16.mxu0 (!%p140_p9), %v542_v3  ;;  %v469_v6 = vld [vmem:[%s700_s1 + $0x18] sm:$0xff] (!%p140_p9)   ;;  %421 = vmatprep.mubr.msk.bf16.mxu0 (!%p140_p9), %vm543_vm0, %v542_v3  ;;  %v470_v7 = vld [vmem:[%s700_s1 + $0x20] sm:$0xff] (!%p140_p9)   ;;  %v471_v8 = vld [vmem:[%s700_s1 + $0x28] sm:$0xff] (!%p140_p9)   ;;  %s159_s27 = sand.u32 (!%p140_p9), 1, %s532_s13  }
   0xf   : > { %406 = vmatpush3.bf16.msra.mxu0 (!%p140_p9), %v466_v2  ;;  %v472_v9 = vld [vmem:[%s700_s1 + $0x30] sm:$0xff] (!%p140_p9)   ;;  %v473_v10 = vld [vmem:[%s700_s1 + $0x38] sm:$0xff] (!%p140_p9)   ;;  %v383_v29 = vld [vmem:[%s701_s2] ss:$0 sm:$0xff] (!%p140_p9)  ;;  %s393_s4 = sshll.u32 (!%p140_p9), %s586_s16, 7  ;;  %s544_s11 = smov (!%p140_p9), [#allocation2]  }
  0x10   : > { %407 = vmatprep.subr.bf16.mxu0 (!%p140_p9), %v542_v3  ;;  %s657_s9 = scalar_lea.hbm (!%p140_p9), %s702_s3, %s393_s4  ;;  %s482_s17 = sshll.u32 (!%p140_p9), %s544_s11, 4  ;;  %s483_s17 = int_to_ptr.vmem [resolvable:$false] %s482_s17 }
  0x11   : > { %s484_s19 = scalar_lea.vmem (!%p140_p9), %s483_s17, 256 }
  0x13   : > { %408 = vmatpush3.bf16.msra.mxu0 (!%p140_p9), %v467_v4 }
  0x14   : > { %409 = vmatprep.subr.bf16.mxu0 (!%p140_p9), %v542_v3 }
  0x15   : > { %s163_s24 = scalar_select %p162_p10, %s586_s16, 1 }
  0x16   : > { %s305_s16 = scalar_lea.sflag [#allocation3], %s159_s27 }
  0x17   : > { %s382_s25 = sshll.u32 %s163_s24, 3  ;;  %410 = vmatpush3.bf16.msra.mxu0 %v468_v5 }
  0x18   : > { %s165_s28 = scalar_lea.vmem %s699_s0, %s382_s25  ;;  %411 = vmatprep.subr.bf16.mxu0 %v542_v3 }
  0x19   : > { %v618_v0 = vld [vmem:[%s165_s28] sm:$0xff]  ;;  %s381_s28 = sshll.u32 %s159_s27, 3 }
  0x1a   : > { %168 = vadd.xlane.f32.xlu0 %v618_v0  ;;  %v170_v1 = vmul.f32 %v618_v0, %v618_v0  ;;  %s161_s5 = scalar_lea.vmem [#allocation2], %s381_s28 }
  0x1b   : > { %412 = vmatpush3.bf16.msra.mxu0 %v469_v6  ;;  %s318_s6 = sshll.u32 %s161_s5, 4  ;;  %s659_s6 = int_to_ptr.vmem [resolvable:$true] %s318_s6 }
  0x1c   : > { %413 = vmatprep.subr.bf16.mxu0 %v542_v3  ;;  %s478_s10 = scalar_lea.vmem %s659_s6, 128  ;;  %p485_p0 = scmp.lt.s32.totalorder %s659_s6, %s483_s17 }
  0x1d   : > { %p479_p11 = scmp.ne.s32.totalorder %s659_s6, %s478_s10  ;;  %p486_p1 = scmp.lt.s32.totalorder %s484_s19, %s478_s10 }
  0x1e   : > { %171 = vadd.xlane.f32.xlu0 %v170_v1 }
  0x1f   : > { %414 = vmatpush3.bf16.msra.mxu0 %v470_v7  ;;  %p480_p12 = pnand %p479_p11, %p603_p5  ;;  %p487_p2 = por %p486_p1, %p485_p0 }
  0x20   : > { %415 = vmatprep.subr.bf16.mxu0 %v542_v3 }
  0x21   : > { %p481_p13 = pneg %p480_p12 }
  0x23   : > { %416 = vmatpush3.bf16.msra.mxu0 %v471_v8  ;;  %p488_p3 = pnand %p487_p2, %p481_p13 }
  0x24   : > { %417 = vmatprep.subr.bf16.mxu0 %v542_v3 }
  0x27   : > { %418 = vmatpush3.bf16.msra.mxu0 %v472_v9 }
  0x28   : > { %419 = vmatprep.subr.bf16.mxu0 %v542_v3 }
  0x2b   : > { %420 = vmatpush3.bf16.msra.mxu0 %v473_v10 }
  0xa7   : > { %v169_v11 = vpop.xlane.xlu0 %168 }
  0xa8   : > { %v173_v12 = vmul.f32 0.0078125, %v169_v11 }
  0xaa   : > { %v174_v13 = vmul.f32 128.0, %v173_v12  ;;  %v188_v25 = vsub.f32 %v618_v0, %v173_v12 }
  0xab   : > { %v172_v14 = vpop.xlane.xlu0 %171 }
  0xac   : > { %v175_v15 = vmul.f32 %v174_v13, %v173_v12 }
  0xae   : > { %v176_v16 = vsub.f32 %v172_v14, %v175_v15 }
  0xb0   : > { %v177_v17 = vmul.f32 0.007874016, %v176_v16 }
  0xb2   : > { %v178_v18 = vmax.f32 %v177_v17, 0.0 }
  0xb4   : > { %474 = vrsqrt.f32 %v178_v18  ;;  %vm181_vm1 = vcmp.eq.f32.partialorder %v178_v18, inf  ;;  %v184_v21 = vand.u32 2147483648, %v178_v18  ;;  %vm183_vm2 = vcmp.eq.f32.partialorder %v178_v18, 0.0 }
  0xbe   : > { %v475_v19 = vpop.eup %474 }
  0xbf   : > { %v180_v20 = vmul.f32 %v475_v19, %v178_v18 }
  0xc1   : > { %v182_v22 = vsel %vm181_vm1, %v178_v18, %v180_v20 }
  0xc2   : > { %v185_v23 = vsel %vm183_vm2, %v184_v21, %v182_v22 }
  0xc3   : > { %v186_v24 = vadd.f32 1e-06, %v185_v23 }
  0xc5   : > { %476 = vrcp.f32 %v186_v24 }
  0xcf   : > { %v477_v26 = vpop.eup %476 }
  0xd0   : > { %v189_v27 = vmul.f32 %v477_v26, %v188_v25 }
  0xd2   : > { %v190_v28 = vpack.c.bf16 %v189_v27, %v189_v27 }
  0xd4   : > { %422 = vmatmul.mubr.bf16.vlgmr.msra.gmra.mrb[0].mxu0 %v190_v28 }
 0x1a7   : > { %v296_v30 = vpop.f32.mrb[0].mxu0 }
 0x1a8   : > { %v297_v31 = vadd.f32 %v383_v29, %v296_v30  ;;  %v423_v32 = vpop.f32.mrb[1].mxu0 }
 0x1a9   : > { %v299_v33 = vpop.f32.mrb[2].mxu0 }
 0x1aa   : > { %v302_v34 = vadd.f32 %v297_v31, %v618_v0  ;;  %v424_v35 = vpop.f32.mrb[3].mxu0 }
 0x1ac   : > { %303 = vst [vmem:[%s161_s5] sm:$0xff] %v302_v34 }
 0x1ad   : > { %491 = shalt.err (!%p488_p3)
}
 0x1ae   : > { %s492_s20 = scalar_lea.hbm %s657_s9, 128  ;;  %s496_s26 = scalar_lea.hbm %s702_s3, 256 }
 0x1af   : > { %p493_p4 = scmp.ne.s32.totalorder %s657_s9, %s492_s20  ;;  %p497_p9 = scmp.lt.u32.totalorder %s657_s9, %s702_s3 }
 0x1b0   : > { %p498_p10 = scmp.lt.u32.totalorder %s496_s26, %s492_s20  ;;  %p500_p12 = scmp.lt.u32.totalorder %s492_s20, %s657_s9 }
 0x1b1   : > { %p494_p7 = pnand %p493_p4, %p603_p5 }
 0x1b2   : > { %p499_p11 = por %p498_p10, %p497_p9 }
 0x1b3   : > { %p495_p8 = pneg %p494_p7 }
 0x1b4   : > { %p501_p13 = por %p500_p12, %p499_p11 }
 0x1b6   : > { %p502_p0 = pnand %p501_p13, %p495_p8 }
 0x1b8   : > { %505 = shalt.err (!%p502_p0)
}
 0x1b9   : > { %425 = dma.vmem_to_hbm [thread:$0]  (%p603_p5), %s659_s6, 128, %s657_s9, %s305_s16  }
 0x1ba PF: > { %p431_p1 = scmp.ge.s32.totalorder %s540_s15, 2  ;;  %s330_s29 = sand.u32 1, %s528_s12  }
 0x1bb   : > { %s331_s30 = scalar_lea.sflag [#allocation3], %s330_s29 }
 0x1bc   : > { %p428_p2 = pnand %p431_p1, %p607_p6 }
 0x1be   : > { %523 = dma.done.wait (!%p428_p2), %s331_s30, 128  }
 0x1bf   : > { %525 = vsyncadd (!%p428_p2), %s331_s30, 4294967168  ;;  %p13_p3 = scmp.ge.s32.totalorder %s590_s18, 4   ;;  %s705_s12 = smov %s532_s13 }
 0x1c0   : > { %s706_s13 = smov %s536_s14  ;;  %s707_s14 = smov %s601_s21 }
 0x1c1   : > { %s708_s15 = smov %s590_s18  ;;  %15 = sbr.rel (!%p13_p3) target bundleno = 3 (0x3), region = 67 }
 0x1c8   :  { %336 = vsyncpa [#allocation3], 1 }
 0x1c9   :  { %338 = vsyncpa [#allocation3 + $0x1], 1 }

</bundles_post_ra>
